<compile_context>
chip_gen: v7x
topology: tpu7x:2x2x1
jax: 0.10.0
libtpu: 0.0.40
codegen_flags: <defaults>
</compile_context>

<pallas_src>
import jax
import jax.numpy as jnp
from jax.experimental import pallas as pl
from jax.experimental.pallas import tpu as pltpu

_LANE = 128
_MAX_COLS = 2048  # lane-width cap for the flattened slab


def _min_sublane(dtype):
    # Sub-32-bit dtypes pack along sublanes: min tile (8,128) f32, (16,128) bf16,
    # (32,128) int8/fp8.
    return {4: 8, 2: 16, 1: 32}.get(jnp.dtype(dtype).itemsize, 8)


def _vmem_capacity_bytes():
    try:
        return int(pltpu.get_tpu_info().vmem_capacity_bytes)
    except Exception:
        return 64 * 1024 * 1024  # conservative default: v7x per-TensorCore VMEM


def _make_activation_kernel(activation):
    def kernel(x_ref, o_ref):
        x = x_ref[...]
        y = x + x  # blocks(x) = x (Identity); shortcut residual = x (Identity)
        if activation == "relu":
            y = jnp.maximum(y, 0)  # scalar 0: no full-tile broadcast per step
        elif activation == "leaky_relu":
            y = jnp.where(y >= 0, y, y * 0.01)
        elif activation == "selu":
            alpha = 1.6732632423543772
            scale = 1.0507009873554805
            yf = y.astype(jnp.float32)
            y = (scale * jnp.where(yf >= 0, yf, alpha * (jnp.exp(yf) - 1.0))).astype(x.dtype)
        elif activation == "none":
            pass
        else:
            raise ValueError(f"unsupported activation: {activation}")
        o_ref[...] = y.astype(o_ref.dtype)

    return kernel


def _choose_layout(total, dtype):
    """Pick a lane-dense 2D slab (rows, cols), tile_rows, 1-D grid and pad elems."""
    itemsize = jnp.dtype(dtype).itemsize
    sub = _min_sublane(dtype)

    # Keep 4x tile bytes (in + out, double-buffered) within ~half of physical VMEM.
    vmem = _vmem_capacity_bytes()
    tile_cap_bytes = max(1 << 20, min(8 * 1024 * 1024, vmem // 8))

    # Lane width: largest multiple of 128 (<= _MAX_COLS) that divides the element
    # count -> no padding, unmasked lane-dense stores.
    cols = 0
    max_cols = min(_MAX_COLS, (total // _LANE) * _LANE)
    for c in range(max_cols, 0, -_LANE):
        if total % c == 0:
            cols = c
            break
    pad = 0
    if cols == 0:
        # Last resort: element count not a multiple of 128 -> pad the flat array.
        cols = _LANE
        pad = (-total) % cols
    rows = (total + pad) // cols

    # Tile rows: multiple of the dtype's min sublane count, capped by tile bytes.
    tr_cap = max(sub, (tile_cap_bytes // (cols * itemsize)) // sub * sub)
    if rows > tr_cap:
        tile_rows = tr_cap
    elif rows >= 2 * sub:
        # Everything fits in one tile: still emit >=2 grid steps so the
        # "parallel" axis shards across v7x's two TensorCores.
        tile_rows = pl.cdiv(pl.cdiv(rows, 2), sub) * sub
    else:
        tile_rows = rows  # single block, full-extent sublane dim
    grid = pl.cdiv(rows, tile_rows)  # ragged final block handled by Pallas
    return rows, cols, tile_rows, grid, pad


def residual_block_forward(x, *, in_channels, out_channels, activation="relu",
                           donate_input=True):
    """Pallas TPU ResidualBlock.forward: activate(blocks(x) + shortcut(x)).

    blocks and shortcut are both Identity in this base module, so the forward
    pass is activate(x + x) regardless of should_apply_shortcut.
    """
    # TODO(synk): a real projection shortcut / conv blocks (as in ResNet
    # subclasses) are not implemented here; only the Identity base module.
    del in_channels, out_channels

    orig_shape = x.shape
    total = x.size
    rows, cols, tile_rows, grid, pad = _choose_layout(total, x.dtype)

    # Layout plumbing only: flatten to a lane-dense 2D slab (free-ish under jit).
    flat = x.reshape(-1)
    if pad:
        flat = jnp.pad(flat, (0, pad))  # last-resort path only
    x2d = flat.reshape(rows, cols)

    vmem_limit = min(64 * 1024 * 1024, (_vmem_capacity_bytes() * 3) // 4)

    out2d = pl.pallas_call(
        _make_activation_kernel(activation),
        out_shape=jax.ShapeDtypeStruct((rows, cols), x2d.dtype),
        grid=(grid,),
        in_specs=[pl.BlockSpec((tile_rows, cols), lambda i: (i, 0))],
        out_specs=pl.BlockSpec((tile_rows, cols), lambda i: (i, 0)),
        input_output_aliases=({0: 0} if donate_input else {}),
        compiler_params=pltpu.CompilerParams(
            dimension_semantics=("parallel",),
            vmem_limit_bytes=vmem_limit,
        ),
    )(x2d)

    if pad:
        return out2d.reshape(-1)[:total].reshape(orig_shape)
    return out2d.reshape(orig_shape)


if __name__ == "__main__":
    key = jax.random.PRNGKey(0)
    N, C, H, W = 2, 4, 16, 16
    x = jax.random.normal(key, (N, C, H, W), dtype=jnp.float32)

    # Pure-JAX reference computed BEFORE the donating kernel call.
    ref = jnp.maximum(x + x, 0.0)
    x_shape, x_dtype = x.shape, x.dtype

    fwd = jax.jit(
        lambda a: residual_block_forward(
            a, in_channels=C, out_channels=C, activation="relu", donate_input=True),
        donate_argnums=0,
    )
    out = jax.block_until_ready(fwd(x))
    assert out.shape == x_shape and out.dtype == x_dtype
    assert jnp.allclose(out, ref, atol=1e-6, rtol=1e-6)

    # Extra coverage: element count not divisible by 128 (pad fallback path).
    x2 = jax.random.normal(jax.random.PRNGKey(1), (2, 3, 5, 7), dtype=jnp.float32)
    out2 = jax.block_until_ready(
        residual_block_forward(x2, in_channels=3, out_channels=3, donate_input=False))
    assert jnp.allclose(out2, jnp.maximum(x2 + x2, 0.0), atol=1e-6, rtol=1e-6)

    # Extra coverage: bf16 input (16-sublane min-tile path).
    x3 = jax.random.normal(jax.random.PRNGKey(2), (2, 4, 16, 16), dtype=jnp.bfloat16)
    out3 = jax.block_until_ready(
        residual_block_forward(x3, in_channels=4, out_channels=4, donate_input=False))
    assert out3.dtype == jnp.bfloat16
    assert jnp.allclose(out3.astype(jnp.float32),
                        jnp.maximum(x3 + x3, 0).astype(jnp.float32), atol=1e-2)

    print("KERNEL_OK")
</pallas_src>

<mosaic_0001>
module attributes {stable_mosaic.version = 11 : i64} {
  func.func @kernel(%arg0: i32, %arg1: memref<1x2048xf32, #tpu.memory_space<vmem>>, %arg2: memref<1x2048xf32, #tpu.memory_space<vmem>>) attributes {dimension_semantics = [#tpu.dimension_semantics<parallel>], iteration_bounds = array<i64: 1>, scalar_prefetch = 0 : i64, scratch_operands = 0 : i64, tpu.core_type = #tpu.core_type<tc>, window_params = [{transform_indices = @transform_0, window_bounds = array<i64: 1, 2048>}, {transform_indices = @transform_1, window_bounds = array<i64: 1, 2048>}]} {
    %c0 = arith.constant 0 : index
    %c0_0 = arith.constant 0 : index
    %0 = vector.load %arg1[%c0, %c0_0] : memref<1x2048xf32, #tpu.memory_space<vmem>>, vector<1x2048xf32>
    %1 = arith.addf %0, %0 : vector<1x2048xf32>
    %cst = arith.constant 0.000000e+00 : f32
    %2 = vector.broadcast %cst : f32 to vector<1x2048xf32>
    %3 = arith.maximumf %1, %2 : vector<1x2048xf32>
    %c0_1 = arith.constant 0 : index
    %c0_2 = arith.constant 0 : index
    %4 = vector.load %arg2[%c0_1, %c0_2] : memref<1x2048xf32, #tpu.memory_space<vmem>>, vector<1x2048xf32>
    tpu.vector_store %arg2[%c0_1, %c0_2], %3 {strides = array<i32>} : memref<1x2048xf32, #tpu.memory_space<vmem>>, vector<1x2048xf32>,
    return
  }
  func.func @transform_0(%arg0: i32) -> (i32, i32) {
    %c0_i32 = arith.constant 0 : i32
    %c0_i32_0 = arith.constant 0 : i32
    return %arg0, %c0_i32 : i32, i32
  }
  func.func @transform_1(%arg0: i32) -> (i32, i32) {
    %c0_i32 = arith.constant 0 : i32
    %c0_i32_0 = arith.constant 0 : i32
    return %arg0, %c0_i32 : i32, i32
  }
}

</mosaic_0001>

<bundles_post_ra>
// kernel: _lambda_.1
= control target key start
LH: loop header
LB: loop body
LE: loop exit
PB: predicated region body
PF: predicated region fallthrough
CT: control target
= control target key end

     0   :  { %s42_s0 = inlined_call_operand.vmem [shape: f32[1,2048], index: 0, kind: input, shape index: {}, may-alias: {0,1}]   ;;  %s43_s1 = inlined_call_operand.vmem [shape: f32[1,2048], index: 1, kind: output, shape index: {}, may-alias: {0,1}]  }
   0x1   :  { %v8_v0 = vld [vmem:[%s42_s0] sm:$0xff]  ;;  %v9_v1 = vld [vmem:[%s42_s0 + $0x8] sm:$0xff] }
   0x2   :  { %v10_v2 = vadd.f32 %v8_v0, %v8_v0  ;;  %v11_v3 = vadd.f32 %v9_v1, %v9_v1 }
   0x4   :  { %v12_v4 = vmax.f32 %v10_v2, 0.0  ;;  %v13_v5 = vmax.f32 %v11_v3, 0.0 }
   0x6   :  { %14 = vst [vmem:[%s43_s1] sm:$0xff] %v12_v4  ;;  %15 = vst [vmem:[%s43_s1 + $0x8] sm:$0xff] %v13_v5 }

</bundles_post_ra>
